<compile_context>
chip_gen: v6e
topology: v6e:2x2x1
jax: 0.10.0
libtpu: 0.0.40
codegen_flags: <defaults>
</compile_context>

<pallas_src>
import jax
import jax.numpy as jnp
from jax.experimental import pallas as pl
from jax.experimental.pallas import tpu as pltpu

_LANES = 128                    # vreg lane width; last dim of every block
_TILE_BYTES = 4 * 1024 * 1024   # ~4 MiB per tile -> per-step overhead <10% on v7x
_SMALL_N = 2048                 # below this, tiling / lane-densifying buys nothing


def _rows_per_block(dtype):
    """Rows per (rows, 128) tile so each tile carries ~_TILE_BYTES of traffic."""
    itemsize = jnp.dtype(dtype).itemsize
    rows = _TILE_BYTES // (_LANES * itemsize)     # 8192 f32, 16384 bf16, 32768 i8
    return max(256, (rows // 32) * 32)            # multiple of sublane tile for f32/bf16/i8


def _affine_kernel(wb_ref, x_ref, o_ref):
    # wb_ref lives in SMEM as float32; compute in f32, cast on store.
    w = wb_ref[0]
    b = wb_ref[1]
    x = x_ref[...].astype(jnp.float32)
    o_ref[...] = (x * w + b).astype(o_ref.dtype)


def _small_forward(x, wb):
    # Trivially small inputs: single block, no grid (launch/tiling overhead dominates).
    return pl.pallas_call(
        _affine_kernel,
        out_shape=jax.ShapeDtypeStruct(x.shape, x.dtype),
        grid_spec=pl.GridSpec(
            grid=(),
            in_specs=[
                pl.BlockSpec(memory_space=pltpu.MemorySpace.SMEM),  # (w, b) f32
                pl.BlockSpec(memory_space=pltpu.MemorySpace.VMEM),  # x
            ],
            out_specs=pl.BlockSpec(memory_space=pltpu.MemorySpace.VMEM),
        ),
    )(wb, x)


def _tiled_forward(flat, wb):
    """Lane-dense, auto-pipelined path for anything above a couple of KiB."""
    n = flat.shape[0]
    rows = (n + _LANES - 1) // _LANES
    pad = rows * _LANES - n
    if pad:
        # Only a sub-128 remainder is ever padded; the multiple-of-128 case
        # (the common one for big tensors) has zero extra passes over x.
        flat = jnp.pad(flat, (0, pad))
    slab = flat.reshape(rows, _LANES)

    # Block covers the full row extent for medium inputs (grid of 1); otherwise a
    # ~4 MiB tile.  A partially out-of-bounds final block is clipped by Pallas:
    # OOB reads are unspecified (harmless for elementwise), OOB writes discarded.
    block_rows = min(_rows_per_block(slab.dtype), rows)
    grid = (pl.cdiv(rows, block_rows),)

    out = pl.pallas_call(
        _affine_kernel,
        out_shape=jax.ShapeDtypeStruct(slab.shape, slab.dtype),
        grid_spec=pltpu.PrefetchScalarGridSpec(
            num_scalar_prefetch=1,  # wb -> SMEM, passed as first kernel arg
            grid=grid,
            in_specs=[pl.BlockSpec((block_rows, _LANES), lambda i, wb: (i, 0))],
            out_specs=pl.BlockSpec((block_rows, _LANES), lambda i, wb: (i, 0)),
        ),
        compiler_params=pltpu.CompilerParams(
            dimension_semantics=("parallel",),   # shard grid across TCs on v7x
            vmem_limit_bytes=32 << 20,           # 2x2 double-buffered 4 MiB tiles = 16 MiB
        ),
    )(wb, slab)

    out_flat = out.reshape(-1)
    if pad:
        out_flat = out_flat[:n]   # drop the sub-128 remainder only
    return out_flat


def regression_forward(x, w, b):
    """Pallas TPU implementation of RegressionModel.forward: y = w * x + b.

    x: (N, 1) array (any float dtype), w: (1,), b: (1,).  Returns same shape/dtype as x.
    """
    # Keep the scalars in float32 for SMEM regardless of x's dtype.
    wb = jnp.concatenate([jnp.ravel(w), jnp.ravel(b)]).astype(jnp.float32)  # (2,)
    if x.size < _SMALL_N:
        return _small_forward(x, wb)
    return _tiled_forward(x.reshape(-1), wb).reshape(x.shape)


if __name__ == "__main__":
    key = jax.random.PRNGKey(0)
    k_w, k_b, k_mid, k_big = jax.random.split(key, 4)

    # Parameters: torch.rand(1) -> uniform [0, 1), shape (1,)
    w = jax.random.uniform(k_w, (1,), dtype=jnp.float32)
    b = jax.random.uniform(k_b, (1,), dtype=jnp.float32)

    # The exact input from the original module: column vector (5, 1).
    x = jnp.array([5.0, 7.0, 12.0, 16.0, 20.0], dtype=jnp.float32).reshape(-1, 1)
    y = regression_forward(x, w, b)
    jax.block_until_ready(y)
    assert y.shape == x.shape
    assert jnp.allclose(y, w[0] * x + b[0], atol=1e-6), "small-path mismatch"

    # Medium input: lane-dense single-block path with a sub-128 ragged tail.
    x_mid = jax.random.uniform(k_mid, (40_000, 1), dtype=jnp.float32) * 20.0
    y_mid = regression_forward(x_mid, w, b)
    jax.block_until_ready(y_mid)
    assert y_mid.shape == x_mid.shape
    assert jnp.allclose(y_mid, w[0] * x_mid + b[0], atol=1e-5), "medium-path mismatch"

    # Larger input: multi-step grid (2 blocks) with a clipped (partially OOB) final block.
    x_big = jax.random.uniform(k_big, (1_100_000, 1), dtype=jnp.float32) * 20.0
    y_big = regression_forward(x_big, w, b)
    jax.block_until_ready(y_big)
    assert y_big.shape == x_big.shape
    assert jnp.allclose(y_big, w[0] * x_big + b[0], atol=1e-5), "tiled-path mismatch"

    print("KERNEL_OK")
</pallas_src>

<mosaic_0001>
module attributes {stable_mosaic.version = 11 : i64} {
  func.func @_affine_kernel(%arg0: memref<2xf32, #tpu.memory_space<smem>>, %arg1: memref<5x1xf32, #tpu.memory_space<vmem>>, %arg2: memref<5x1xf32, #tpu.memory_space<vmem>>) attributes {dimension_semantics = [], scalar_prefetch = 0 : i64, scratch_operands = 0 : i64, tpu.core_type = #tpu.core_type<tc>} {
    %c0 = arith.constant 0 : index
    %0 = memref.load %arg0[%c0] : memref<2xf32, #tpu.memory_space<smem>>
    %c1 = arith.constant 1 : index
    %1 = memref.load %arg0[%c1] : memref<2xf32, #tpu.memory_space<smem>>
    %c0_0 = arith.constant 0 : index
    %c0_1 = arith.constant 0 : index
    %2 = vector.load %arg1[%c0_0, %c0_1] : memref<5x1xf32, #tpu.memory_space<vmem>>, vector<5x1xf32>
    %3 = vector.broadcast %0 : f32 to vector<5x1xf32>
    %4 = arith.mulf %2, %3 : vector<5x1xf32>
    %5 = vector.broadcast %1 : f32 to vector<5x1xf32>
    %6 = arith.addf %4, %5 : vector<5x1xf32>
    %c0_2 = arith.constant 0 : index
    %c0_3 = arith.constant 0 : index
    %7 = vector.load %arg2[%c0_2, %c0_3] : memref<5x1xf32, #tpu.memory_space<vmem>>, vector<5x1xf32>
    tpu.vector_store %arg2[%c0_2, %c0_3], %6 {strides = array<i32>} : memref<5x1xf32, #tpu.memory_space<vmem>>, vector<5x1xf32>,
    return
  }
}

</mosaic_0001>

<bundles_post_ra>
// kernel: tpu_custom_call.1
= control target key start
LH: loop header
LB: loop body
LE: loop exit
PB: predicated region body
PF: predicated region fallthrough
CT: control target
= control target key end

     0   :  { %7 = vsyncpa [#allocation3], 0  ;;  %s79_s0 = inlined_call_operand.vmem [shape: f32[2], index: 0, kind: input, shape index: {}]   ;;  %s80_s1 = inlined_call_operand.vmem [shape: f32[5,1], index: 1, kind: input, shape index: {}]   ;;  %s81_s2 = inlined_call_operand.vmem [shape: f32[5,1], index: 2, kind: output, shape index: {}]  }
   0x1   :  { %s14_s11 = sshll.u32 %s79_s0, 4  ;;  %s15_s11 = int_to_ptr.vmem [resolvable:$true] %s14_s11 }
   0x2   :  { %s40_s12 = scalar_lea.vmem %s15_s11, 16  ;;  %p45_p1 = scmp.lt.s32.totalorder %s15_s11, %s15_s11 }
   0x3   :  { %p41_p0 = scmp.ne.s32.totalorder %s15_s11, %s40_s12  ;;  %p46_p2 = scmp.lt.s32.totalorder %s40_s12, %s40_s12 }
   0x5   :  { %p47_p3 = por %p46_p2, %p45_p1 }
   0x7   :  { %p48_p4 = pnand %p47_p3, %p41_p0 }
   0x9   :  { %51 = shalt.err (!%p48_p4)
}
   0xa   :  { %s54_s13 = smov [#allocation2]  }
   0xb   :  { %17 = dma.vmem_to_smem %s15_s11, 16, %s54_s13, [#allocation3]  }
   0xc   :  { %52 = dma.done.wait [#allocation3], 16  }
   0xd   :  { %53 = vsyncadd [#allocation3], 4294967280 }
   0xe   :  { %23 = sfence }
   0xf   :  { %s24_s14 = sld [smem:[#allocation2]]  ;;  %v26_v0 = vld [vmem:[%s80_s1] sm:$0x1f]  ;;  %vm31_vm0 = vcmask 4096  }
  0x10   :  { %s38_s15 = sld [smem:[#allocation2 + $0x1]] }
  0x15   :  { %v27_v1 = vstv %s24_s14 }
  0x16   :  { %v28_v2 = vmul.f32 %v27_v1, %v26_v0  ;;  %v29_v3 = vstv %s38_s15 }
  0x18   :  { %v30_v4 = vadd.f32 %v29_v3, %v28_v2 }
  0x1a   :  { %32 = vst.msk [vmem:[%s81_s2] sm:$0x1f] %vm31_vm0, %v30_v4 }
  0x1b   :  { %37 = vsyncpa [#allocation3], 1 }

</bundles_post_ra>
